<compile_context>
chip_gen: v5e
topology: v5e:2x2
jax: 0.10.0
libtpu: 0.0.40
codegen_flags: <defaults>
</compile_context>

<pallas_src>
import jax
import jax.numpy as jnp
from jax.experimental import pallas as pl
from jax.experimental.pallas import tpu as pltpu


# ~48 MiB: fits inside v7x's 64 MiB/TC with headroom for double-buffered
# input/output blocks, and is far below v5e/v6e's 128 MiB.
_ATTN_VMEM_LIMIT = 48 * 1024 * 1024


def _vmem_full():
    return pl.BlockSpec(memory_space=pltpu.MemorySpace.VMEM)


def _row_tile(rows, target=1024):
    """Largest row tile <= target that divides `rows`, else the full extent."""
    if rows <= target:
        return rows
    t = target
    while t >= 8:
        if rows % t == 0:
            return t
        t //= 2
    return rows


def _mm_bf16(a, b):
    """MXU matmul with bf16 operands and f32 accumulation."""
    return jnp.dot(a.astype(jnp.bfloat16), b.astype(jnp.bfloat16),
                   preferred_element_type=jnp.float32)


def _pos_enc_linear(p, wp1):
    # K=3 contraction kept on the VPU as three broadcast FMAs (MXU is wasted
    # on a 3-deep contraction).
    return (p[:, 0:1] * wp1[0:1, :] + p[:, 1:2] * wp1[1:2, :]
            + p[:, 2:3] * wp1[2:3, :])


def _max_pool_rows(h, stride):
    # Group-of-`stride` max over consecutive rows (points).
    # TODO(synk): a strided-slice maximum tree (ref[pl.ds(k, m, stride=s)])
    #             would keep this purely on the VPU; reshape+reduce kept here
    #             for lowering safety (minor cost).
    n, c = h.shape
    return jnp.max(h.reshape(n // stride, stride, c), axis=1)


# ----------------------------------------------------------------------------
# Kernels
# ----------------------------------------------------------------------------
def _linear_bn_relu_kernel(x_ref, w_ref, s_ref, t_ref, o_ref):
    h = jnp.dot(x_ref[...], w_ref[...], preferred_element_type=jnp.float32)
    o_ref[...] = jnp.maximum(h * s_ref[...] + t_ref[...], 0.0)


def _res_stack_kernel(x_ref, *refs):
    """N fused ResidualPointBlocks: x <- relu(x + BN(W2 @ relu(BN(W1 @ x))))."""
    o_ref = refs[-1]
    wrefs = refs[:-1]
    x = x_ref[...]
    for bi in range(len(wrefs) // 6):
        w1, s1, t1, w2, s2, t2 = wrefs[bi * 6:(bi + 1) * 6]
        h = jnp.dot(x, w1[...], preferred_element_type=jnp.float32)
        h = jnp.maximum(h * s1[...] + t1[...], 0.0)
        h = jnp.dot(h, w2[...], preferred_element_type=jnp.float32)
        h = h * s2[...] + t2[...]
        x = jnp.maximum(x + h, 0.0)
    o_ref[...] = x


def _make_attention_kernel(with_epilogue):
    """Flash-style (j-tiled) residual vector attention, per-channel softmax."""

    def kernel(p_q_ref, p_j_ref, x_q_ref, x_j_ref,
               wq_ref, bq_ref, wkv_ref, bkv_ref,
               wp1_ref, bp1_ref, wp2_ref, bp2_ref,
               wg1_ref, bg1_ref, wg2_ref, bg2_ref, *rest):
        if with_epilogue:
            we_ref, se_ref, te_ref = rest[:3]
            rest = rest[3:]
        o_ref, q_s, a1q_s, m_s, l_s, acc_s = rest

        j = pl.program_id(2)
        nj = pl.num_programs(2)

        x_q = x_q_ref[0]                                  # (tq, c)
        tq, c = x_q.shape

        @pl.when(j == 0)
        def _init():
            # fold the pos-enc bias into the q-side term:
            # linear1(p_i - p_j) = p_i@Wp1 + b - p_j@Wp1
            a1q_s[...] = _pos_enc_linear(p_q_ref[0], wp1_ref[...]) + bp1_ref[...]
            q_s[...] = (jnp.dot(x_q, wq_ref[...],
                                preferred_element_type=jnp.float32) + bq_ref[...])
            m_s[...] = jnp.full_like(m_s, -jnp.inf)
            l_s[...] = jnp.zeros_like(l_s)
            acc_s[...] = jnp.zeros_like(acc_s)

        x_j = x_j_ref[0]                                  # (tj, c)
        tj = x_j.shape[0]
        a1j = _pos_enc_linear(p_j_ref[0], wp1_ref[...])   # (tj, c)

        # fused K/V projection: one lane-dense (c, 2c) matmul
        kv = _mm_bf16(x_j, wkv_ref[...]) + bkv_ref[...]   # (tj, 2c)
        k = kv[:, :c]
        v = kv[:, c:]

        q = q_s[...]
        a1q = a1q_s[...]

        # relative positional encoding for this (q-tile, j-tile) block
        pe_h = jnp.maximum(a1q[:, None, :] - a1j[None, :, :], 0.0)   # (tq, tj, c)
        pe = (_mm_bf16(pe_h.reshape(tq * tj, c), wp2_ref[...])
              + bp2_ref[...]).reshape(tq, tj, c)

        # gamma MLP on (q_i - k_j + delta_ij)
        logits = q[:, None, :] - k[None, :, :] + pe
        g = jnp.maximum(_mm_bf16(logits.reshape(tq * tj, c), wg1_ref[...])
                        + bg1_ref[...], 0.0)
        g = (_mm_bf16(g, wg2_ref[...]) + bg2_ref[...]).reshape(tq, tj, c)

        # per-channel online softmax over the neighbour axis j
        m_prev = m_s[...]
        m_new = jnp.maximum(m_prev, jnp.max(g, axis=1))   # (tq, c)
        alpha = jnp.exp(m_prev - m_new)
        w = jnp.exp(g - m_new[:, None, :])                # (tq, tj, c)
        l_s[...] = alpha * l_s[...] + jnp.sum(w, axis=1)
        acc_s[...] = alpha * acc_s[...] + jnp.sum(w * (v[None, :, :] + pe), axis=1)
        m_s[...] = m_new

        @pl.when(j == nj - 1)
        def _finalize():
            y = acc_s[...] * pl.reciprocal(l_s[...], approx=True)
            out = x_q + y                                 # residual connection
            if with_epilogue:                             # fused MLP(c,c): Linear+BN+ReLU
                h = jnp.dot(out, we_ref[...], preferred_element_type=jnp.float32)
                out = jnp.maximum(h * se_ref[...] + te_ref[...], 0.0)
            o_ref[0] = out.astype(o_ref.dtype)

    return kernel


def _trans_down_lin_kernel(x_ref, w_ref, s_ref, t_ref, we_ref, se_ref, te_ref,
                           o_ref):
    """TransitionDown (Linear+BN+ReLU, stride max-pool) + fused MLP epilogue."""
    x = x_ref[0]                                          # (n, cin)
    n = x.shape[0]
    m = o_ref.shape[1]
    stride = n // m
    h = jnp.dot(x, w_ref[...], preferred_element_type=jnp.float32)
    h = jnp.maximum(h * s_ref[...] + t_ref[...], 0.0)
    pooled = _max_pool_rows(h, stride)                    # (m, cout)
    y = jnp.dot(pooled, we_ref[...], preferred_element_type=jnp.float32)
    o_ref[0] = jnp.maximum(y * se_ref[...] + te_ref[...], 0.0)


def _make_td_res_max_kernel(stride, nblocks):
    """TransitionDown + nblocks residual blocks + global max, fused per batch."""

    def kernel(x_ref, w_ref, s_ref, t_ref, *rest):
        res = rest[:6 * nblocks]
        o_ref = rest[6 * nblocks]
        x = x_ref[0]                                      # (n, cin)
        h = jnp.dot(x, w_ref[...], preferred_element_type=jnp.float32)
        h = jnp.maximum(h * s_ref[...] + t_ref[...], 0.0)
        z = _max_pool_rows(h, stride)                     # (n//stride, cout)
        for bi in range(nblocks):
            w1, s1, t1, w2, s2, t2 = res[bi * 6:(bi + 1) * 6]
            hh = jnp.dot(z, w1[...], preferred_element_type=jnp.float32)
            hh = jnp.maximum(hh * s1[...] + t1[...], 0.0)
            hh = jnp.dot(hh, w2[...], preferred_element_type=jnp.float32)
            hh = hh * s2[...] + t2[...]
            z = jnp.maximum(z + hh, 0.0)
        # fused global max over points (torch.max(x, 2))
        o_ref[0] = jnp.max(z, axis=0, keepdims=True)

    return kernel


def _head_kernel(x_ref, w1_ref, b1_ref, s1_ref, t1_ref,
                 w2_ref, b2_ref, s2_ref, t2_ref, w3_ref, b3_ref, o_ref):
    # final MLP (dropout = identity in eval) + log_softmax
    x = x_ref[...]                                        # (B, 128)
    h = jnp.dot(x, w1_ref[...], preferred_element_type=jnp.float32) + b1_ref[...]
    h = jnp.maximum(h * s1_ref[...] + t1_ref[...], 0.0)
    h = jnp.dot(h, w2_ref[...], preferred_element_type=jnp.float32) + b2_ref[...]
    h = jnp.maximum(h * s2_ref[...] + t2_ref[...], 0.0)
    logits = jnp.dot(h, w3_ref[...], preferred_element_type=jnp.float32) + b3_ref[...]
    z = logits - jnp.max(logits, axis=1, keepdims=True)
    o_ref[...] = z - jnp.log(jnp.sum(jnp.exp(z), axis=1, keepdims=True))


# ----------------------------------------------------------------------------
# Wrappers (pallas_call glue)
# ----------------------------------------------------------------------------
def linear_bn_relu(x, w, scale, shift, row_tile=1024):
    rows, cin = x.shape
    cout = w.shape[1]
    tr = _row_tile(rows, row_tile)
    consts = (w, scale, shift)
    return pl.pallas_call(
        _linear_bn_relu_kernel,
        out_shape=jax.ShapeDtypeStruct((rows, cout), jnp.float32),
        grid=(rows // tr,),
        in_specs=[pl.BlockSpec((tr, cin), lambda i: (i, 0))]
                 + [pl.BlockSpec(a.shape, lambda i, _nd=a.ndim: (0,) * _nd)
                    for a in consts],
        out_specs=pl.BlockSpec((tr, cout), lambda i: (i, 0)),
        compiler_params=pltpu.CompilerParams(dimension_semantics=("parallel",)),
    )(x, *consts)


def residual_stack(x, blocks, row_tile=1024):
    rows, c = x.shape
    tr = _row_tile(rows, row_tile)
    flat = []
    for pr in blocks:
        flat += [pr["w1"], pr["s1"], pr["t1"], pr["w2"], pr["s2"], pr["t2"]]
    return pl.pallas_call(
        _res_stack_kernel,
        out_shape=jax.ShapeDtypeStruct((rows, c), jnp.float32),
        grid=(rows // tr,),
        in_specs=[pl.BlockSpec((tr, c), lambda i: (i, 0))]
                 + [pl.BlockSpec(a.shape, lambda i, _nd=a.ndim: (0,) * _nd)
                    for a in flat],
        out_specs=pl.BlockSpec((tr, c), lambda i: (i, 0)),
        compiler_params=pltpu.CompilerParams(dimension_semantics=("parallel",)),
    )(x, *flat)


_TF_NAMES = ("wq", "bq", "wkv", "bkv", "wp1", "bp1", "wp2", "bp2",
             "wg1", "bg1", "wg2", "bg2")


def point_transformer_block(p, x, pr, epilogue=None, tile=128):
    B, N, C = x.shape
    tq = min(tile, N)
    tj = min(tile, N)
    assert N % tq == 0 and N % tj == 0 and (tq % 8 == 0 or tq == N)
    ws = [pr[n] for n in _TF_NAMES]
    if epilogue is not None:
        ws += list(epilogue)

    def const_spec(a):
        return pl.BlockSpec(a.shape, lambda b, qi, ji, _nd=a.ndim: (0,) * _nd)

    kernel = _make_attention_kernel(with_epilogue=epilogue is not None)
    return pl.pallas_call(
        kernel,
        out_shape=jax.ShapeDtypeStruct((B, N, C), jnp.float32),
        grid=(B, N // tq, N // tj),
        in_specs=[pl.BlockSpec((1, tq, 3), lambda b, qi, ji: (b, qi, 0)),
                  pl.BlockSpec((1, tj, 3), lambda b, qi, ji: (b, ji, 0)),
                  pl.BlockSpec((1, tq, C), lambda b, qi, ji: (b, qi, 0)),
                  pl.BlockSpec((1, tj, C), lambda b, qi, ji: (b, ji, 0))]
                 + [const_spec(a) for a in ws],
        out_specs=pl.BlockSpec((1, tq, C), lambda b, qi, ji: (b, qi, 0)),
        scratch_shapes=[pltpu.VMEM((tq, C), jnp.float32) for _ in range(5)],
        compiler_params=pltpu.CompilerParams(
            dimension_semantics=("parallel", "parallel", "arbitrary"),
            vmem_limit_bytes=_ATTN_VMEM_LIMIT),
    )(p, p, x, x, *ws)


def transition_down(p, x, pr, epilogue, stride=8):
    w, s, t = pr
    we, se, te = epilogue
    B, N, Cin = x.shape
    M = N // stride
    Ce = we.shape[1]
    consts = (w, s, t, we, se, te)
    out = pl.pallas_call(
        _trans_down_lin_kernel,
        out_shape=jax.ShapeDtypeStruct((B, M, Ce), jnp.float32),
        grid=(B,),
        in_specs=[pl.BlockSpec((1, N, Cin), lambda b: (b, 0, 0))]
                 + [pl.BlockSpec(a.shape, lambda b, _nd=a.ndim: (0,) * _nd)
                    for a in consts],
        out_specs=pl.BlockSpec((1, M, Ce), lambda b: (b, 0, 0)),
        compiler_params=pltpu.CompilerParams(dimension_semantics=("parallel",)),
    )(x, *consts)
    # TODO(synk): FPS-based coordinate subsampling not implemented; strided.
    return p[:, ::stride, :], out


def transition_down_res_max(x, td, blocks, stride=8):
    w, s, t = td
    B, N, Cin = x.shape
    Cout = w.shape[1]
    flat = []
    for pr in blocks:
        flat += [pr["w1"], pr["s1"], pr["t1"], pr["w2"], pr["s2"], pr["t2"]]
    consts = [w, s, t] + flat
    kernel = _make_td_res_max_kernel(stride, len(blocks))
    out = pl.pallas_call(
        kernel,
        out_shape=jax.ShapeDtypeStruct((B, 1, Cout), jnp.float32),
        grid=(B,),
        in_specs=[pl.BlockSpec((1, N, Cin), lambda b: (b, 0, 0))]
                 + [pl.BlockSpec(a.shape, lambda b, _nd=a.ndim: (0,) * _nd)
                    for a in consts],
        out_specs=pl.BlockSpec((1, 1, Cout), lambda b: (b, 0, 0)),
        compiler_params=pltpu.CompilerParams(dimension_semantics=("parallel",)),
    )(x, *consts)
    return out.reshape(B, Cout)


def head(feat, pr):
    B = feat.shape[0]
    k = pr["w3"].shape[1]
    args = (feat, pr["w1"], pr["b1"], pr["s1"], pr["t1"],
            pr["w2"], pr["b2"], pr["s2"], pr["t2"], pr["w3"], pr["b3"])
    return pl.pallas_call(
        _head_kernel,
        out_shape=jax.ShapeDtypeStruct((B, k), jnp.float32),
        in_specs=[_vmem_full() for _ in args],
        out_specs=_vmem_full(),
    )(*args)


# ----------------------------------------------------------------------------
# Full forward pass
# ----------------------------------------------------------------------------
def residual_transformer_forward(p_b3n, params):
    """p_b3n: [B, 3, N] (PyTorch layout). Returns log-probs [B, num_classes]."""
    B, D, N = p_b3n.shape
    p = jnp.transpose(p_b3n, (0, 2, 1)).astype(jnp.float32)       # [B, N, 3]
    pm = params

    # first_mlp: 3 -> 32 (row-tiled, pipelined)
    x = linear_bn_relu(p.reshape(B * N, D), *pm["first_mlp"]).reshape(B, N, -1)

    # transformer1 (flash-tiled vector attention) with lin32 fused as epilogue
    x = point_transformer_block(p, x, pm["transformer1"], epilogue=pm["lin32"])

    # trans_down1 (32 -> 64, stride 8) with lin64 fused as epilogue
    p1, x = transition_down(p, x, pm["trans_down1"], epilogue=pm["lin64"], stride=8)

    # transformer2 on the down-sampled cloud
    x = point_transformer_block(p1, x, pm["transformer2"])

    # resp1_1 .. resp1_3 fused into one row-tiled kernel
    B1, M1, C1 = x.shape
    x = residual_stack(
        x.reshape(B1 * M1, C1),
        [pm["resp1_1"], pm["resp1_2"], pm["resp1_3"]]).reshape(B1, M1, C1)

    # trans_down2 (64 -> 128) + resp2_1..3 + global max, fused per batch element
    feat = transition_down_res_max(
        x, pm["trans_down2"],
        [pm["resp2_1"], pm["resp2_2"], pm["resp2_3"]], stride=8)   # [B, 128]

    return head(feat, pm["final_mlp"])                             # [B, k] log-probs


# ----------------------------------------------------------------------------
# Deterministic parameter construction (synthetic, eval-mode module)
# ----------------------------------------------------------------------------
def make_params(key, num_classes=40):
    kit = iter(jax.random.split(key, 128))
    bn_eps = 1e-5

    def dense(cin, cout):
        return jax.random.normal(next(kit), (cin, cout), jnp.float32) * (cin ** -0.5)

    def bias(c):
        return 0.1 * jax.random.normal(next(kit), (1, c), jnp.float32)

    def bn(c):
        # freshly initialised BatchNorm1d in eval(): gamma=1, beta=0, mean=0, var=1
        scale = jnp.full((1, c), 1.0 / (1.0 + bn_eps) ** 0.5, jnp.float32)
        shift = jnp.zeros((1, c), jnp.float32)
        return scale, shift

    def mlp(cin, cout):
        s, t = bn(cout)
        return (dense(cin, cout), s, t)

    def transformer(c):
        return dict(
            wq=dense(c, c), bq=bias(c),
            wkv=dense(c, 2 * c), bkv=bias(2 * c),          # fused K/V projection
            wp1=dense(3, c), bp1=bias(c), wp2=dense(c, c), bp2=bias(c),
            wg1=dense(c, c), bg1=bias(c), wg2=dense(c, c), bg2=bias(c),
        )

    def resblock(c):
        s1, t1 = bn(c)
        s2, t2 = bn(c)
        return dict(w1=dense(c, c), s1=s1, t1=t1, w2=dense(c, c), s2=s2, t2=t2)

    return dict(
        first_mlp=mlp(3, 32),
        transformer1=transformer(32),
        lin32=mlp(32, 32),
        trans_down1=mlp(32, 64),
        lin64=mlp(64, 64),
        transformer2=transformer(64),
        resp1_1=resblock(64), resp1_2=resblock(64), resp1_3=resblock(64),
        trans_down2=mlp(64, 128),
        resp2_1=resblock(128), resp2_2=resblock(128), resp2_3=resblock(128),
        final_mlp=dict(
            w1=dense(128, 64), b1=bias(64), s1=bn(64)[0], t1=bn(64)[1],
            w2=dense(64, 64), b2=bias(64), s2=bn(64)[0], t2=bn(64)[1],
            w3=dense(64, num_classes), b3=bias(num_classes),
        ),
    )


if __name__ == "__main__":
    key = jax.random.PRNGKey(0)
    pkey, wkey = jax.random.split(key)

    B, N = 2, 128                                   # small demo shapes (torch comment: 16 x 1024)
    p_in = jax.random.normal(pkey, (B, 3, N), jnp.float32)
    params = make_params(wkey, num_classes=40)

    out = residual_transformer_forward(p_in, params)
    out = jax.block_until_ready(out)

    assert out.shape == (B, 40), out.shape
    # log_softmax rows must (almost) exponentiate-sum to 1
    row_sums = jnp.sum(jnp.exp(out), axis=1)
    assert bool(jnp.all(jnp.isfinite(out)))
    assert bool(jnp.all(jnp.abs(row_sums - 1.0) < 1e-3)), row_sums
    print("KERNEL_OK")
</pallas_src>

<mosaic_0001>
module attributes {stable_mosaic.version = 11 : i64} {
  func.func @_linear_bn_relu_kernel(%arg0: i32, %arg1: memref<256x3xf32, #tpu.memory_space<vmem>>, %arg2: memref<3x32xf32, #tpu.memory_space<vmem>>, %arg3: memref<1x32xf32, #tpu.memory_space<vmem>>, %arg4: memref<1x32xf32, #tpu.memory_space<vmem>>, %arg5: memref<256x32xf32, #tpu.memory_space<vmem>>) attributes {dimension_semantics = [#tpu.dimension_semantics<parallel>], iteration_bounds = array<i64: 1>, scalar_prefetch = 0 : i64, scratch_operands = 0 : i64, tpu.core_type = #tpu.core_type<tc>, window_params = [{transform_indices = @transform_0, window_bounds = array<i64: 256, 3>}, {pipeline_mode = #tpu.pipeline_mode<synchronous>, transform_indices = @transform_1, window_bounds = array<i64: 3, 32>}, {pipeline_mode = #tpu.pipeline_mode<synchronous>, transform_indices = @transform_2, window_bounds = array<i64: 1, 32>}, {pipeline_mode = #tpu.pipeline_mode<synchronous>, transform_indices = @transform_3, window_bounds = array<i64: 1, 32>}, {transform_indices = @transform_4, window_bounds = array<i64: 256, 32>}]} {
    %c0 = arith.constant 0 : index
    %c0_0 = arith.constant 0 : index
    %0 = vector.load %arg1[%c0, %c0_0] : memref<256x3xf32, #tpu.memory_space<vmem>>, vector<256x3xf32>
    %c0_1 = arith.constant 0 : index
    %c0_2 = arith.constant 0 : index
    %1 = vector.load %arg2[%c0_1, %c0_2] : memref<3x32xf32, #tpu.memory_space<vmem>>, vector<3x32xf32>
    %cst = arith.constant dense<0.000000e+00> : vector<256x32xf32>
    %2 = tpu.matmul %0, %1, %cst {dimension_numbers = #tpu.dot_dimension_numbers<[1], [0], [0], [1], [0, 0, 1, 1], [], []>} : vector<256x3xf32>, vector<3x32xf32>, vector<256x32xf32> -> vector<256x32xf32>
    %c0_3 = arith.constant 0 : index
    %c0_4 = arith.constant 0 : index
    %3 = vector.load %arg3[%c0_3, %c0_4] : memref<1x32xf32, #tpu.memory_space<vmem>>, vector<1x32xf32>
    %4 = vector.broadcast %3 : vector<1x32xf32> to vector<256x32xf32>
    %5 = arith.mulf %2, %4 : vector<256x32xf32>
    %c0_5 = arith.constant 0 : index
    %c0_6 = arith.constant 0 : index
    %6 = vector.load %arg4[%c0_5, %c0_6] : memref<1x32xf32, #tpu.memory_space<vmem>>, vector<1x32xf32>
    %7 = vector.broadcast %6 : vector<1x32xf32> to vector<256x32xf32>
    %8 = arith.addf %5, %7 : vector<256x32xf32>
    %cst_7 = arith.constant 0.000000e+00 : f32
    %9 = vector.broadcast %cst_7 : f32 to vector<256x32xf32>
    %10 = arith.maximumf %8, %9 : vector<256x32xf32>
    %c0_8 = arith.constant 0 : index
    %c0_9 = arith.constant 0 : index
    %11 = vector.load %arg5[%c0_8, %c0_9] : memref<256x32xf32, #tpu.memory_space<vmem>>, vector<256x32xf32>
    tpu.vector_store %arg5[%c0_8, %c0_9], %10 {strides = array<i32>} : memref<256x32xf32, #tpu.memory_space<vmem>>, vector<256x32xf32>,
    return
  }
  func.func @transform_0(%arg0: i32) -> (i32, i32) {
    %c0_i32 = arith.constant 0 : i32
    %c0_i32_0 = arith.constant 0 : i32
    return %arg0, %c0_i32 : i32, i32
  }
  func.func @transform_1(%arg0: i32) -> (i32, i32) {
    %c0_i32 = arith.constant 0 : i32
    %c0_i32_0 = arith.constant 0 : i32
    %c0_i32_1 = arith.constant 0 : i32
    return %c0_i32, %c0_i32_0 : i32, i32
  }
  func.func @transform_2(%arg0: i32) -> (i32, i32) {
    %c0_i32 = arith.constant 0 : i32
    %c0_i32_0 = arith.constant 0 : i32
    %c0_i32_1 = arith.constant 0 : i32
    return %c0_i32, %c0_i32_0 : i32, i32
  }
  func.func @transform_3(%arg0: i32) -> (i32, i32) {
    %c0_i32 = arith.constant 0 : i32
    %c0_i32_0 = arith.constant 0 : i32
    %c0_i32_1 = arith.constant 0 : i32
    return %c0_i32, %c0_i32_0 : i32, i32
  }
  func.func @transform_4(%arg0: i32) -> (i32, i32) {
    %c0_i32 = arith.constant 0 : i32
    %c0_i32_0 = arith.constant 0 : i32
    return %arg0, %c0_i32 : i32, i32
  }
}

</mosaic_0001>

<bundles_post_ra>
// kernel: tpu_custom_call.1
= control target key start
LH: loop header
LB: loop body
LE: loop exit
PB: predicated region body
PF: predicated region fallthrough
CT: control target
= control target key end

     0   :  { %vm147_vm0 = vcmask 1042432   ;;  %vm50_vm1 = vcmask 23552   ;;  %vm368_vm2 = vcmask 261120   ;;  %s801_s1 = inlined_call_operand.vmem [shape: f32[3,32], index: 1, kind: input, shape index: {}]   ;;  %s802_s0 = inlined_call_operand.vmem [shape: f32[256,3], index: 0, kind: input, shape index: {}]   ;;  %s803_s2 = inlined_call_operand.vmem [shape: f32[1,32], index: 2, kind: input, shape index: {}]   ;;  %s804_s3 = inlined_call_operand.vmem [shape: f32[1,32], index: 3, kind: input, shape index: {}]   ;;  %s805_s4 = inlined_call_operand.vmem [shape: f32[256,32], index: 4, kind: output, shape index: {}]  }
   0x1   :  { %v49_v0 = vld [vmem:[%s801_s1] sm:$0x7]  ;;  %v34_v5 = vld [vmem:[%s802_s0 + $0x88] sm:$0xff]  ;;  %v35_v9 = vld [vmem:[%s802_s0 + $0x90] sm:$0xff] }
   0x2   :  { %v33_v1 = vld [vmem:[%s802_s0 + $0x80] sm:$0xff]  ;;  %439 = vmatpush.msk.msra.mxu2 %vm147_vm0, %v49_v0  ;;  %440 = vmatpush.msk.msra.mxu3 %vm147_vm0, %v49_v0  ;;  %v42_v6 = vld [vmem:[%s802_s0 + $0xc8] sm:$0xff]  ;;  %v43_v10 = vld [vmem:[%s802_s0 + $0xd0] sm:$0xff] }
   0x3   :  { %v41_v2 = vld [vmem:[%s802_s0 + $0xc0] sm:$0xff]  ;;  %422 = vmatmul.msk.f32.vlgmr.msra.gmra.mxu2 %vm50_vm1, %v33_v1  ;;  %405 = vmatpush.msk.msra.mxu0 %vm147_vm0, %v49_v0  ;;  %v18_v7 = vld [vmem:[%s802_s0 + $0x8] sm:$0xff]  ;;  %v19_v11 = vld [vmem:[%s802_s0 + $0x10] sm:$0xff] }
   0x4   :  { %v17_v3 = vld [vmem:[%s802_s0] sm:$0xff]  ;;  %430 = vmatmul.msk.f32.vlgmr.msra.gmra.mxu3 %vm50_vm1, %v41_v2  ;;  %438 = vmatpush.msk.msra.mxu1 %vm147_vm0, %v49_v0  ;;  %v26_v8 = vld [vmem:[%s802_s0 + $0x48] sm:$0xff]  ;;  %v27_v12 = vld [vmem:[%s802_s0 + $0x50] sm:$0xff] }
   0x5   :  { %v25_v4 = vld [vmem:[%s802_s0 + $0x40] sm:$0xff]  ;;  %406 = vmatmul.msk.f32.vlgmr.msra.gmra.mxu0 %vm50_vm1, %v17_v3  ;;  %v36_v13 = vld [vmem:[%s802_s0 + $0x98] sm:$0xff]  ;;  %v38_v21 = vld [vmem:[%s802_s0 + $0xa8] sm:$0xff] }
   0x6   :  { %414 = vmatmul.msk.f32.vlgmr.msra.gmra.mxu1 %vm50_vm1, %v25_v4  ;;  %v44_v14 = vld [vmem:[%s802_s0 + $0xd8] sm:$0xff]  ;;  %v37_v17 = vld [vmem:[%s802_s0 + $0xa0] sm:$0xff]  ;;  %v46_v22 = vld [vmem:[%s802_s0 + $0xe8] sm:$0xff] }
   0x7   :  { %v20_v15 = vld [vmem:[%s802_s0 + $0x18] sm:$0xff]  ;;  %v45_v18 = vld [vmem:[%s802_s0 + $0xe0] sm:$0xff]  ;;  %v22_v23 = vld [vmem:[%s802_s0 + $0x28] sm:$0xff] }
   0x8   :  { %v28_v16 = vld [vmem:[%s802_s0 + $0x58] sm:$0xff]  ;;  %v21_v19 = vld [vmem:[%s802_s0 + $0x20] sm:$0xff]  ;;  %v30_v24 = vld [vmem:[%s802_s0 + $0x68] sm:$0xff] }
   0x9   :  { %v29_v20 = vld [vmem:[%s802_s0 + $0x60] sm:$0xff]  ;;  %v39_v25 = vld [vmem:[%s802_s0 + $0xb0] sm:$0xff]  ;;  %v40_v29 = vld [vmem:[%s802_s0 + $0xb8] sm:$0xff] }
   0xa   :  { %v47_v26 = vld [vmem:[%s802_s0 + $0xf0] sm:$0xff]  ;;  %v48_v30 = vld [vmem:[%s802_s0 + $0xf8] sm:$0xff]  ;;  %v602_v33 = vld [vmem:[%s803_s2] ss:$0 sm:$0xff] }
   0xb   :  { %423 = vmatmul.msk.f32.gmra.mxu2 %vm50_vm1, %v34_v5  ;;  %v23_v27 = vld [vmem:[%s802_s0 + $0x30] sm:$0xff]  ;;  %v24_v31 = vld [vmem:[%s802_s0 + $0x38] sm:$0xff]  ;;  %v607_v34 = vld [vmem:[%s804_s3] ss:$0 sm:$0xff] }
   0xc   :  { %431 = vmatmul.msk.f32.gmra.mxu3 %vm50_vm1, %v42_v6  ;;  %v31_v28 = vld [vmem:[%s802_s0 + $0x70] sm:$0xff]  ;;  %v32_v32 = vld [vmem:[%s802_s0 + $0x78] sm:$0xff] }
   0xd   :  { %407 = vmatmul.msk.f32.gmra.mxu0 %vm50_vm1, %v18_v7 }
   0xe   :  { %415 = vmatmul.msk.f32.gmra.mxu1 %vm50_vm1, %v26_v8 }
  0x13   :  { %424 = vmatmul.msk.f32.gmra.mxu2 %vm50_vm1, %v35_v9 }
  0x14   :  { %432 = vmatmul.msk.f32.gmra.mxu3 %vm50_vm1, %v43_v10 }
  0x15   :  { %408 = vmatmul.msk.f32.gmra.mxu0 %vm50_vm1, %v19_v11 }
  0x16   :  { %416 = vmatmul.msk.f32.gmra.mxu1 %vm50_vm1, %v27_v12 }
  0x1b   :  { %425 = vmatmul.msk.f32.gmra.mxu2 %vm50_vm1, %v36_v13 }
  0x1c   :  { %433 = vmatmul.msk.f32.gmra.mxu3 %vm50_vm1, %v44_v14 }
  0x1d   :  { %409 = vmatmul.msk.f32.gmra.mxu0 %vm50_vm1, %v20_v15 }
  0x1e   :  { %417 = vmatmul.msk.f32.gmra.mxu1 %vm50_vm1, %v28_v16 }
  0x23   :  { %426 = vmatmul.msk.f32.gmra.mxu2 %vm50_vm1, %v37_v17 }
  0x24   :  { %434 = vmatmul.msk.f32.gmra.mxu3 %vm50_vm1, %v45_v18 }
  0x25   :  { %410 = vmatmul.msk.f32.gmra.mxu0 %vm50_vm1, %v21_v19 }
  0x26   :  { %418 = vmatmul.msk.f32.gmra.mxu1 %vm50_vm1, %v29_v20 }
  0x2b   :  { %427 = vmatmul.msk.f32.gmra.mxu2 %vm50_vm1, %v38_v21 }
  0x2c   :  { %435 = vmatmul.msk.f32.gmra.mxu3 %vm50_vm1, %v46_v22 }
  0x2d   :  { %411 = vmatmul.msk.f32.gmra.mxu0 %vm50_vm1, %v22_v23 }
  0x2e   :  { %419 = vmatmul.msk.f32.gmra.mxu1 %vm50_vm1, %v30_v24 }
  0x33   :  { %428 = vmatmul.msk.f32.gmra.mxu2 %vm50_vm1, %v39_v25 }
  0x34   :  { %436 = vmatmul.msk.f32.gmra.mxu3 %vm50_vm1, %v47_v26 }
  0x35   :  { %412 = vmatmul.msk.f32.gmra.mxu0 %vm50_vm1, %v23_v27 }
  0x36   :  { %420 = vmatmul.msk.f32.gmra.mxu1 %vm50_vm1, %v31_v28 }
  0x3b   :  { %429 = vmatmul.msk.f32.gmra.mxu2 %vm50_vm1, %v40_v29 }
  0x3c   :  { %437 = vmatmul.msk.f32.gmra.mxu3 %vm50_vm1, %v48_v30 }
  0x3d   :  { %413 = vmatmul.msk.f32.gmra.mxu0 %vm50_vm1, %v24_v31 }
  0x3e   :  { %421 = vmatmul.msk.f32.gmra.mxu1 %vm50_vm1, %v32_v32 }
  0x82   :  { %v168_v35 = vpop.f32.mrf.mxu0 }
  0x83   :  { %v192_v36 = vpop.f32.mrf.mxu1  ;;  %v268_v37 = vmul.f32 %v602_v33, %v168_v35 }
  0x84   :  { %v276_v38 = vmul.f32 %v602_v33, %v192_v36 }
  0x85   :  { %v304_v39 = vadd.f32 %v607_v34, %v268_v37 }
  0x86   :  { %v312_v40 = vadd.f32 %v607_v34, %v276_v38  ;;  %v216_v41 = vpop.f32.mrf.mxu2 }
  0x87   :  { %v240_v42 = vpop.f32.mrf.mxu3  ;;  %v336_v43 = vmax.f32 %v304_v39, 0.0  ;;  %v284_v45 = vmul.f32 %v602_v33, %v216_v41 }
  0x88   :  { %v344_v44 = vmax.f32 %v312_v40, 0.0  ;;  %v292_v46 = vmul.f32 %v602_v33, %v240_v42 }
  0x89   :  { %369 = vst.msk [vmem:[%s805_s4] sm:$0xff] %vm368_vm2, %v336_v43  ;;  %v320_v47 = vadd.f32 %v607_v34, %v284_v45 }
  0x8a   :  { %v328_v48 = vadd.f32 %v607_v34, %v292_v46  ;;  %377 = vst.msk [vmem:[%s805_s4 + $0x40] sm:$0xff] %vm368_vm2, %v344_v44  ;;  %v171_v49 = vpop.f32.mrf.mxu0 }
  0x8b   :  { %v195_v50 = vpop.f32.mrf.mxu1  ;;  %v352_v51 = vmax.f32 %v320_v47, 0.0  ;;  %v269_v53 = vmul.f32 %v602_v33, %v171_v49 }
  0x8c   :  { %v360_v52 = vmax.f32 %v328_v48, 0.0  ;;  %v277_v54 = vmul.f32 %v602_v33, %v195_v50 }
  0x8d   :  { %385 = vst.msk [vmem:[%s805_s4 + $0x80] sm:$0xff] %vm368_vm2, %v352_v51  ;;  %v305_v55 = vadd.f32 %v607_v34, %v269_v53 }
  0x8e   :  { %v313_v56 = vadd.f32 %v607_v34, %v277_v54  ;;  %393 = vst.msk [vmem:[%s805_s4 + $0xc0] sm:$0xff] %vm368_vm2, %v360_v52  ;;  %v219_v57 = vpop.f32.mrf.mxu2 }
  0x8f   :  { %v243_v58 = vpop.f32.mrf.mxu3  ;;  %v337_v59 = vmax.f32 %v305_v55, 0.0  ;;  %v285_v61 = vmul.f32 %v602_v33, %v219_v57 }
  0x90   :  { %v345_v60 = vmax.f32 %v313_v56, 0.0  ;;  %v293_v62 = vmul.f32 %v602_v33, %v243_v58 }
  0x91   :  { %370 = vst.msk [vmem:[%s805_s4 + $0x8] sm:$0xff] %vm368_vm2, %v337_v59  ;;  %v321_v63 = vadd.f32 %v607_v34, %v285_v61 }
  0x92   :  { %v329_v0 = vadd.f32 %v607_v34, %v293_v62  ;;  %378 = vst.msk [vmem:[%s805_s4 + $0x48] sm:$0xff] %vm368_vm2, %v345_v60  ;;  %v174_v1 = vpop.f32.mrf.mxu0 }
  0x93   :  { %v198_v2 = vpop.f32.mrf.mxu1  ;;  %v353_v3 = vmax.f32 %v321_v63, 0.0  ;;  %v270_v5 = vmul.f32 %v602_v33, %v174_v1 }
  0x94   :  { %v361_v4 = vmax.f32 %v329_v0, 0.0  ;;  %v278_v6 = vmul.f32 %v602_v33, %v198_v2 }
  0x95   :  { %386 = vst.msk [vmem:[%s805_s4 + $0x88] sm:$0xff] %vm368_vm2, %v353_v3  ;;  %v306_v7 = vadd.f32 %v607_v34, %v270_v5 }
  0x96   :  { %v314_v8 = vadd.f32 %v607_v34, %v278_v6  ;;  %394 = vst.msk [vmem:[%s805_s4 + $0xc8] sm:$0xff] %vm368_vm2, %v361_v4  ;;  %v222_v9 = vpop.f32.mrf.mxu2 }
  0x97   :  { %v246_v10 = vpop.f32.mrf.mxu3  ;;  %v338_v11 = vmax.f32 %v306_v7, 0.0  ;;  %v286_v13 = vmul.f32 %v602_v33, %v222_v9 }
  0x98   :  { %v346_v12 = vmax.f32 %v314_v8, 0.0  ;;  %v294_v14 = vmul.f32 %v602_v33, %v246_v10 }
  0x99   :  { %371 = vst.msk [vmem:[%s805_s4 + $0x10] sm:$0xff] %vm368_vm2, %v338_v11  ;;  %v322_v15 = vadd.f32 %v607_v34, %v286_v13 }
  0x9a   :  { %v330_v16 = vadd.f32 %v607_v34, %v294_v14  ;;  %379 = vst.msk [vmem:[%s805_s4 + $0x50] sm:$0xff] %vm368_vm2, %v346_v12  ;;  %v177_v17 = vpop.f32.mrf.mxu0 }
  0x9b   :  { %v201_v18 = vpop.f32.mrf.mxu1  ;;  %v354_v19 = vmax.f32 %v322_v15, 0.0  ;;  %v271_v21 = vmul.f32 %v602_v33, %v177_v17 }
  0x9c   :  { %v362_v20 = vmax.f32 %v330_v16, 0.0  ;;  %v279_v22 = vmul.f32 %v602_v33, %v201_v18 }
  0x9d   :  { %387 = vst.msk [vmem:[%s805_s4 + $0x90] sm:$0xff] %vm368_vm2, %v354_v19  ;;  %v307_v23 = vadd.f32 %v607_v34, %v271_v21 }
  0x9e   :  { %v315_v24 = vadd.f32 %v607_v34, %v279_v22  ;;  %395 = vst.msk [vmem:[%s805_s4 + $0xd0] sm:$0xff] %vm368_vm2, %v362_v20  ;;  %v225_v25 = vpop.f32.mrf.mxu2 }
  0x9f   :  { %v249_v26 = vpop.f32.mrf.mxu3  ;;  %v339_v27 = vmax.f32 %v307_v23, 0.0  ;;  %v287_v29 = vmul.f32 %v602_v33, %v225_v25 }
  0xa0   :  { %v347_v28 = vmax.f32 %v315_v24, 0.0  ;;  %v295_v30 = vmul.f32 %v602_v33, %v249_v26 }
  0xa1   :  { %372 = vst.msk [vmem:[%s805_s4 + $0x18] sm:$0xff] %vm368_vm2, %v339_v27  ;;  %v323_v31 = vadd.f32 %v607_v34, %v287_v29 }
  0xa2   :  { %v331_v32 = vadd.f32 %v607_v34, %v295_v30  ;;  %380 = vst.msk [vmem:[%s805_s4 + $0x58] sm:$0xff] %vm368_vm2, %v347_v28  ;;  %v180_v35 = vpop.f32.mrf.mxu0 }
  0xa3   :  { %v204_v36 = vpop.f32.mrf.mxu1  ;;  %v355_v37 = vmax.f32 %v323_v31, 0.0  ;;  %v272_v39 = vmul.f32 %v602_v33, %v180_v35 }
  0xa4   :  { %v363_v38 = vmax.f32 %v331_v32, 0.0  ;;  %v280_v40 = vmul.f32 %v602_v33, %v204_v36 }
  0xa5   :  { %388 = vst.msk [vmem:[%s805_s4 + $0x98] sm:$0xff] %vm368_vm2, %v355_v37  ;;  %v308_v41 = vadd.f32 %v607_v34, %v272_v39 }
  0xa6   :  { %v316_v42 = vadd.f32 %v607_v34, %v280_v40  ;;  %396 = vst.msk [vmem:[%s805_s4 + $0xd8] sm:$0xff] %vm368_vm2, %v363_v38  ;;  %v228_v43 = vpop.f32.mrf.mxu2 }
  0xa7   :  { %v252_v44 = vpop.f32.mrf.mxu3  ;;  %v340_v45 = vmax.f32 %v308_v41, 0.0  ;;  %v288_v47 = vmul.f32 %v602_v33, %v228_v43 }
  0xa8   :  { %v348_v46 = vmax.f32 %v316_v42, 0.0  ;;  %v296_v48 = vmul.f32 %v602_v33, %v252_v44 }
  0xa9   :  { %373 = vst.msk [vmem:[%s805_s4 + $0x20] sm:$0xff] %vm368_vm2, %v340_v45  ;;  %v324_v49 = vadd.f32 %v607_v34, %v288_v47 }
  0xaa   :  { %v332_v50 = vadd.f32 %v607_v34, %v296_v48  ;;  %381 = vst.msk [vmem:[%s805_s4 + $0x60] sm:$0xff] %vm368_vm2, %v348_v46  ;;  %v183_v51 = vpop.f32.mrf.mxu0 }
  0xab   :  { %v207_v52 = vpop.f32.mrf.mxu1  ;;  %v356_v53 = vmax.f32 %v324_v49, 0.0  ;;  %v273_v55 = vmul.f32 %v602_v33, %v183_v51 }
  0xac   :  { %v364_v54 = vmax.f32 %v332_v50, 0.0  ;;  %v281_v56 = vmul.f32 %v602_v33, %v207_v52 }
  0xad   :  { %389 = vst.msk [vmem:[%s805_s4 + $0xa0] sm:$0xff] %vm368_vm2, %v356_v53  ;;  %v309_v57 = vadd.f32 %v607_v34, %v273_v55 }
  0xae   :  { %v317_v58 = vadd.f32 %v607_v34, %v281_v56  ;;  %397 = vst.msk [vmem:[%s805_s4 + $0xe0] sm:$0xff] %vm368_vm2, %v364_v54  ;;  %v231_v59 = vpop.f32.mrf.mxu2 }
  0xaf   :  { %v255_v60 = vpop.f32.mrf.mxu3  ;;  %v341_v61 = vmax.f32 %v309_v57, 0.0  ;;  %v289_v63 = vmul.f32 %v602_v33, %v231_v59 }
  0xb0   :  { %v349_v62 = vmax.f32 %v317_v58, 0.0  ;;  %v297_v0 = vmul.f32 %v602_v33, %v255_v60 }
  0xb1   :  { %374 = vst.msk [vmem:[%s805_s4 + $0x28] sm:$0xff] %vm368_vm2, %v341_v61  ;;  %v325_v1 = vadd.f32 %v607_v34, %v289_v63 }
  0xb2   :  { %v333_v2 = vadd.f32 %v607_v34, %v297_v0  ;;  %382 = vst.msk [vmem:[%s805_s4 + $0x68] sm:$0xff] %vm368_vm2, %v349_v62  ;;  %v186_v3 = vpop.f32.mrf.mxu0 }
  0xb3   :  { %v210_v4 = vpop.f32.mrf.mxu1  ;;  %v357_v5 = vmax.f32 %v325_v1, 0.0  ;;  %v274_v7 = vmul.f32 %v602_v33, %v186_v3 }
  0xb4   :  { %v365_v6 = vmax.f32 %v333_v2, 0.0  ;;  %v282_v8 = vmul.f32 %v602_v33, %v210_v4 }
  0xb5   :  { %390 = vst.msk [vmem:[%s805_s4 + $0xa8] sm:$0xff] %vm368_vm2, %v357_v5  ;;  %v310_v9 = vadd.f32 %v607_v34, %v274_v7 }
  0xb6   :  { %v318_v10 = vadd.f32 %v607_v34, %v282_v8  ;;  %398 = vst.msk [vmem:[%s805_s4 + $0xe8] sm:$0xff] %vm368_vm2, %v365_v6  ;;  %v234_v11 = vpop.f32.mrf.mxu2 }
  0xb7   :  { %v258_v12 = vpop.f32.mrf.mxu3  ;;  %v342_v13 = vmax.f32 %v310_v9, 0.0  ;;  %v290_v15 = vmul.f32 %v602_v33, %v234_v11 }
  0xb8   :  { %v350_v14 = vmax.f32 %v318_v10, 0.0  ;;  %v298_v16 = vmul.f32 %v602_v33, %v258_v12 }
  0xb9   :  { %375 = vst.msk [vmem:[%s805_s4 + $0x30] sm:$0xff] %vm368_vm2, %v342_v13  ;;  %v326_v17 = vadd.f32 %v607_v34, %v290_v15 }
  0xba   :  { %v334_v18 = vadd.f32 %v607_v34, %v298_v16  ;;  %383 = vst.msk [vmem:[%s805_s4 + $0x70] sm:$0xff] %vm368_vm2, %v350_v14  ;;  %v189_v19 = vpop.f32.mrf.mxu0 }
  0xbb   :  { %v213_v20 = vpop.f32.mrf.mxu1  ;;  %v358_v21 = vmax.f32 %v326_v17, 0.0  ;;  %v275_v23 = vmul.f32 %v602_v33, %v189_v19 }
  0xbc   :  { %v366_v22 = vmax.f32 %v334_v18, 0.0  ;;  %v283_v24 = vmul.f32 %v602_v33, %v213_v20 }
  0xbd   :  { %391 = vst.msk [vmem:[%s805_s4 + $0xb0] sm:$0xff] %vm368_vm2, %v358_v21  ;;  %v311_v25 = vadd.f32 %v607_v34, %v275_v23 }
  0xbe   :  { %v319_v26 = vadd.f32 %v607_v34, %v283_v24  ;;  %399 = vst.msk [vmem:[%s805_s4 + $0xf0] sm:$0xff] %vm368_vm2, %v366_v22  ;;  %v237_v27 = vpop.f32.mrf.mxu2 }
  0xbf   :  { %v261_v28 = vpop.f32.mrf.mxu3  ;;  %v343_v29 = vmax.f32 %v311_v25, 0.0  ;;  %v291_v31 = vmul.f32 %v602_v33, %v237_v27 }
  0xc0   :  { %v351_v30 = vmax.f32 %v319_v26, 0.0  ;;  %v299_v32 = vmul.f32 %v602_v33, %v261_v28 }
  0xc1   :  { %376 = vst.msk [vmem:[%s805_s4 + $0x38] sm:$0xff] %vm368_vm2, %v343_v29  ;;  %v327_v35 = vadd.f32 %v607_v34, %v291_v31 }
  0xc2   :  { %v335_v36 = vadd.f32 %v607_v34, %v299_v32  ;;  %384 = vst.msk [vmem:[%s805_s4 + $0x78] sm:$0xff] %vm368_vm2, %v351_v30 }
  0xc3   :  { %v359_v37 = vmax.f32 %v327_v35, 0.0 }
  0xc4   :  { %v367_v38 = vmax.f32 %v335_v36, 0.0 }
  0xc5   :  { %392 = vst.msk [vmem:[%s805_s4 + $0xb8] sm:$0xff] %vm368_vm2, %v359_v37 }
  0xc6   :  { %400 = vst.msk [vmem:[%s805_s4 + $0xf8] sm:$0xff] %vm368_vm2, %v367_v38 }

</bundles_post_ra>
